<compile_context>
chip_gen: v5e
topology: v5e:2x2
jax: 0.10.0
libtpu: 0.0.40
codegen_flags: <defaults>
</compile_context>

<pallas_src>
import numpy as np
import jax
import jax.numpy as jnp
from jax import lax
from jax.experimental import pallas as pl
from jax.experimental.pallas import tpu as pltpu


def _mish(x):
    # mish(x) = x * tanh(softplus(x)).  With e = exp(min(x, 20)):
    #   tanh(softplus(x)) = (e*e + 2e) / (e*e + 2e + 2)   (exact identity in f32).
    # One EUP transcendental (exp) instead of exp + log + tanh.
    e = jnp.exp(jnp.minimum(x, 20.0))
    num = e * e + 2.0 * e
    return x * (num / (num + 2.0))


def _round_up(a, m):
    return -(-a // m) * m


def trans_block_kn(x_nchw, weight, bias, padding=(0, 0, 0, 0), *,
                   max_lane_tile=512, compute_dtype=jnp.bfloat16):
    """Forward pass of TransBlockKN.

    x_nchw: (N, Cin, H, W) f32; weight: (2, 2, Cin, Cout) [HWIO]; bias: (Cout,).
    padding: (left, right, top, bottom) applied before the conv.
    Returns (N, Cout, Ho, Wo) f32 with Ho = (H_pad - 1) // 2, Wo = (W_pad - 1) // 2.
    """
    n, cin, h, w = x_nchw.shape
    kh, kw_, wcin, cout = weight.shape
    assert (kh, kw_) == (2, 2) and wcin == cin
    p_l, p_r, p_t, p_b = padding

    hp, wp = h + p_t + p_b, w + p_l + p_r
    ho, wo = (hp - 1) // 2, (wp - 1) // 2
    assert ho >= 1 and wo >= 1, "input too small for conv(2x2) + pool(2x2/2)"
    h1, w1 = ho + 1, wo + 1            # parity-plane extents
    q = h1 * w1                        # lanes per image (pooled grid incl. junk col/row)

    # Pad once: user conv padding + 0/1 extra zero row/col so H,W become 2*h1, 2*w1.
    x = jnp.pad(x_nchw, ((0, 0), (0, 0),
                         (p_t, p_b + 2 * h1 - hp),
                         (p_l, p_r + 2 * w1 - wp)))

    # Lane tiling: TP multiple of the 128-aligned halo, batch folded into lanes.
    l_nq = n * q
    halo = _round_up(w1 + 1, 128)                       # lanes needed past a tile
    tp = max(halo, min(max_lane_tile, _round_up(l_nq, 128)))
    tp = _round_up(tp, halo)
    l_out = _round_up(l_nq, tp)
    l_in = l_out + tp                                   # one extra block for the last halo
    nb = l_out // tp

    # Space-to-depth (single XLA fusion, reads x once):
    #   row  = phase(s_parity, t_parity)*Cin + c      -> (4*Cin,)
    #   lane = n*q + i*w1 + j                          -> (N*q,)  , padded to l_in
    # xph[(2s+t)*Cin + c, n*q + i*w1 + j] = x[n, c, 2i+s, 2j+t]   (bf16)
    xph = (x.astype(compute_dtype)
             .reshape(n, cin, h1, 2, w1, 2)
             .transpose(3, 5, 1, 0, 2, 4)               # (s, t, c, n, i, j)
             .reshape(4 * cin, l_nq))
    xph = jnp.pad(xph, ((0, 0), (0, l_in - l_nq)))

    # Fused conv+pool weight: pool position (dy,dx) rows, slab (dy+ky, dx+kx) cols.
    # (2.25x structural zeros; grid-invariant, fine while HBM-bound.)
    w_big = jnp.zeros((4 * cout, 9 * cin), dtype=jnp.float32)
    for dy in range(2):
        for dx in range(2):
            g = dy * 2 + dx
            for ky in range(2):
                for kx in range(2):
                    sl = (dy + ky) * 3 + (dx + kx)
                    w_big = w_big.at[g * cout:(g + 1) * cout,
                                     sl * cin:(sl + 1) * cin].set(weight[ky, kx].T)
    w_big = w_big.astype(compute_dtype)
    b2 = bias.reshape(cout, 1).astype(jnp.float32)

    def kernel(xa_ref, xh_ref, w_ref, b_ref, o_ref):
        # xa_ref: (4*Cin, TP)    parity planes, lane tile j
        # xh_ref: (4*Cin, HALO)  halo lanes starting at (j+1)*TP
        # w_ref : (4*Cout, 9*Cin) bf16 fused weights; b_ref: (Cout, 1) f32
        # o_ref : (Cout, TP)     lane-dense f32 output tile
        xa = _mish(xa_ref[...].astype(jnp.float32))          # bulk EUP/VPU, f32
        xh = _mish(xh_ref[...].astype(jnp.float32))
        xm = jnp.concatenate([xa, xh], axis=1)                # (4*Cin, TP+HALO) f32

        # Rebuild the 9 conv/pool slabs from the 4 parity planes:
        #   slab(s,t) = plane(s%2, t%2) shifted by (s//2)*w1 + (t//2) lanes.
        slabs = []
        for s in range(3):
            for t in range(3):
                phi = (s % 2) * 2 + (t % 2)
                d = (s // 2) * w1 + (t // 2)
                slabs.append(xm[phi * cin:(phi + 1) * cin, d:d + tp])
        x9 = jnp.concatenate(slabs, axis=0).astype(compute_dtype)   # (9*Cin, TP)

        # One MXU contraction covering all 4 taps and all 4 pool positions.
        y = jnp.dot(w_ref[...], x9, preferred_element_type=jnp.float32)  # (4*Cout, TP)

        pooled = jnp.maximum(
            jnp.maximum(y[0 * cout:1 * cout, :], y[1 * cout:2 * cout, :]),
            jnp.maximum(y[2 * cout:3 * cout, :], y[3 * cout:4 * cout, :]))
        o_ref[...] = (pooled + b_ref[...]).astype(o_ref.dtype)

    out_flat = pl.pallas_call(
        kernel,
        out_shape=jax.ShapeDtypeStruct((cout, l_out), jnp.float32),
        grid=(nb,),
        in_specs=[
            pl.BlockSpec((4 * cin, tp), lambda j: (0, j)),
            pl.BlockSpec((4 * cin, halo), lambda j: (0, (j + 1) * (tp // halo))),
            pl.BlockSpec((4 * cout, 9 * cin), lambda j: (0, 0)),
            pl.BlockSpec((cout, 1), lambda j: (0, 0)),
        ],
        out_specs=pl.BlockSpec((cout, tp), lambda j: (0, j)),
        compiler_params=pltpu.CompilerParams(
            dimension_semantics=("parallel",),
            vmem_limit_bytes=48 * 1024 * 1024),
    )(xph, xph, w_big, b2)

    # Crop the junk column/row of each image and the lane padding, go back to NCHW.
    out = out_flat[:, :l_nq].reshape(cout, n, h1, w1)[:, :, :ho, :wo]
    return out.transpose(1, 0, 2, 3)


def trans_block_kn_reference(x_nchw, weight, bias, padding=(0, 0, 0, 0),
                             compute_dtype=jnp.float32):
    """Pure-JAX reference (Mish -> conv 2x2 VALID -> max-pool 2x2/2), NCHW in/out.

    With compute_dtype=bfloat16 it mirrors the kernel's rounding points exactly.
    """
    p_l, p_r, p_t, p_b = padding
    x = x_nchw
    if any(padding):
        x = jnp.pad(x, ((0, 0), (0, 0), (p_t, p_b), (p_l, p_r)))
    xf = x.astype(compute_dtype).astype(jnp.float32)
    xm = _mish(xf).astype(compute_dtype).astype(jnp.float32)
    wf = weight.astype(compute_dtype).astype(jnp.float32)
    y = lax.conv_general_dilated(
        xm, wf, window_strides=(1, 1), padding="VALID",
        dimension_numbers=("NCHW", "HWIO", "NCHW"))
    y = y + bias[None, :, None, None]
    n, cout, hc, wc = y.shape
    ho, wo = hc // 2, wc // 2
    yc = y[:, :, :2 * ho, :2 * wo]
    return jnp.max(yc.reshape(n, cout, ho, 2, wo, 2), axis=(3, 5))


if __name__ == "__main__":
    key = jax.random.PRNGKey(0)
    kx, kw, kb = jax.random.split(key, 3)

    N, Cin, H, W = 2, 4, 16, 16
    Cout = 8

    x = jax.random.normal(kx, (N, Cin, H, W), dtype=jnp.float32)

    # Deterministic parameter init (PyTorch-conv-like uniform scale).
    fan_in = Cin * 2 * 2
    bound = float(1.0 / np.sqrt(fan_in))
    weight = jax.random.uniform(kw, (2, 2, Cin, Cout), jnp.float32, -bound, bound)
    bias = jax.random.uniform(kb, (Cout,), jnp.float32, -bound, bound)

    # Sanity check: the cheap Mish form equals x * tanh(softplus(x)).
    m_exact = x * jnp.tanh(jnp.logaddexp(x, 0.0))
    np.testing.assert_allclose(np.asarray(_mish(x)), np.asarray(m_exact),
                               atol=1e-5, rtol=1e-5)

    fwd = jax.jit(trans_block_kn)
    out = jax.block_until_ready(fwd(x, weight, bias))
    assert out.shape == (N, Cout, 7, 7), out.shape

    # Tight check vs. a reference that mirrors the kernel's bf16 rounding points,
    # loose check vs. the pure-f32 reference (bf16 operand error bound).
    ref_bf16 = trans_block_kn_reference(x, weight, bias, compute_dtype=jnp.bfloat16)
    ref_f32 = trans_block_kn_reference(x, weight, bias, compute_dtype=jnp.float32)
    np.testing.assert_allclose(np.asarray(out), np.asarray(ref_bf16),
                               atol=2e-2, rtol=2e-2)
    np.testing.assert_allclose(np.asarray(out), np.asarray(ref_f32),
                               atol=6e-2, rtol=6e-2)
    print("KERNEL_OK")
</pallas_src>

<mosaic_0001>
module attributes {stable_mosaic.version = 11 : i64} {
  func.func @kernel(%arg0: i32, %arg1: memref<16x128xbf16, #tpu.memory_space<vmem>>, %arg2: memref<16x128xbf16, #tpu.memory_space<vmem>>, %arg3: memref<32x36xbf16, #tpu.memory_space<vmem>>, %arg4: memref<8x1xf32, #tpu.memory_space<vmem>>, %arg5: memref<8x128xf32, #tpu.memory_space<vmem>>) attributes {dimension_semantics = [#tpu.dimension_semantics<parallel>], iteration_bounds = array<i64: 1>, scalar_prefetch = 0 : i64, scratch_operands = 0 : i64, tpu.core_type = #tpu.core_type<tc>, window_params = [{transform_indices = @transform_0, window_bounds = array<i64: 16, 128>}, {transform_indices = @transform_1, window_bounds = array<i64: 16, 128>}, {pipeline_mode = #tpu.pipeline_mode<synchronous>, transform_indices = @transform_2, window_bounds = array<i64: 32, 36>}, {pipeline_mode = #tpu.pipeline_mode<synchronous>, transform_indices = @transform_3, window_bounds = array<i64: 8, 1>}, {transform_indices = @transform_4, window_bounds = array<i64: 8, 128>}]} {
    %c0 = arith.constant 0 : index
    %c0_0 = arith.constant 0 : index
    %0 = vector.load %arg1[%c0, %c0_0] : memref<16x128xbf16, #tpu.memory_space<vmem>>, vector<16x128xbf16>
    %1 = arith.extf %0 : vector<16x128xbf16> to vector<16x128xf32>
    %cst = arith.constant 2.000000e+01 : f32
    %2 = vector.broadcast %cst : f32 to vector<16x128xf32>
    %3 = arith.minimumf %1, %2 : vector<16x128xf32>
    %4 = math.exp %3 : vector<16x128xf32>
    %5 = arith.mulf %4, %4 : vector<16x128xf32>
    %cst_1 = arith.constant 2.000000e+00 : f32
    %6 = vector.broadcast %cst_1 : f32 to vector<16x128xf32>
    %7 = arith.mulf %6, %4 : vector<16x128xf32>
    %8 = arith.addf %5, %7 : vector<16x128xf32>
    %cst_2 = arith.constant 2.000000e+00 : f32
    %9 = vector.broadcast %cst_2 : f32 to vector<16x128xf32>
    %10 = arith.addf %8, %9 : vector<16x128xf32>
    %11 = arith.divf %8, %10 : vector<16x128xf32>
    %12 = arith.mulf %1, %11 : vector<16x128xf32>
    %c0_3 = arith.constant 0 : index
    %c0_4 = arith.constant 0 : index
    %13 = vector.load %arg2[%c0_3, %c0_4] : memref<16x128xbf16, #tpu.memory_space<vmem>>, vector<16x128xbf16>
    %14 = arith.extf %13 : vector<16x128xbf16> to vector<16x128xf32>
    %cst_5 = arith.constant 2.000000e+01 : f32
    %15 = vector.broadcast %cst_5 : f32 to vector<16x128xf32>
    %16 = arith.minimumf %14, %15 : vector<16x128xf32>
    %17 = math.exp %16 : vector<16x128xf32>
    %18 = arith.mulf %17, %17 : vector<16x128xf32>
    %cst_6 = arith.constant 2.000000e+00 : f32
    %19 = vector.broadcast %cst_6 : f32 to vector<16x128xf32>
    %20 = arith.mulf %19, %17 : vector<16x128xf32>
    %21 = arith.addf %18, %20 : vector<16x128xf32>
    %cst_7 = arith.constant 2.000000e+00 : f32
    %22 = vector.broadcast %cst_7 : f32 to vector<16x128xf32>
    %23 = arith.addf %21, %22 : vector<16x128xf32>
    %24 = arith.divf %21, %23 : vector<16x128xf32>
    %25 = arith.mulf %14, %24 : vector<16x128xf32>
    %26 = tpu.concatenate %12, %25 in 1 : vector<16x128xf32>, vector<16x128xf32> -> vector<16x256xf32>
    %27 = vector.extract_strided_slice %26 {offsets = [0, 0], sizes = [4, 128], strides = [1, 1]} : vector<16x256xf32> to vector<4x128xf32>
    %28 = vector.extract_strided_slice %26 {offsets = [4, 0], sizes = [4, 128], strides = [1, 1]} : vector<16x256xf32> to vector<4x128xf32>
    %29 = vector.extract_strided_slice %26 {offsets = [0, 1], sizes = [4, 128], strides = [1, 1]} : vector<16x256xf32> to vector<4x128xf32>
    %30 = vector.extract_strided_slice %26 {offsets = [8, 0], sizes = [4, 128], strides = [1, 1]} : vector<16x256xf32> to vector<4x128xf32>
    %31 = vector.extract_strided_slice %26 {offsets = [12, 0], sizes = [4, 128], strides = [1, 1]} : vector<16x256xf32> to vector<4x128xf32>
    %32 = vector.extract_strided_slice %26 {offsets = [8, 1], sizes = [4, 128], strides = [1, 1]} : vector<16x256xf32> to vector<4x128xf32>
    %33 = vector.extract_strided_slice %26 {offsets = [0, 8], sizes = [4, 128], strides = [1, 1]} : vector<16x256xf32> to vector<4x128xf32>
    %34 = vector.extract_strided_slice %26 {offsets = [4, 8], sizes = [4, 128], strides = [1, 1]} : vector<16x256xf32> to vector<4x128xf32>
    %35 = vector.extract_strided_slice %26 {offsets = [0, 9], sizes = [4, 128], strides = [1, 1]} : vector<16x256xf32> to vector<4x128xf32>
    %36 = tpu.concatenate %27, %28, %29, %30, %31, %32, %33, %34, %35 in 0 : vector<4x128xf32>, vector<4x128xf32>, vector<4x128xf32>, vector<4x128xf32>, vector<4x128xf32>, vector<4x128xf32>, vector<4x128xf32>, vector<4x128xf32>, vector<4x128xf32> -> vector<36x128xf32>
    %37 = arith.truncf %36 : vector<36x128xf32> to vector<36x128xbf16>
    %c0_8 = arith.constant 0 : index
    %c0_9 = arith.constant 0 : index
    %38 = vector.load %arg3[%c0_8, %c0_9] : memref<32x36xbf16, #tpu.memory_space<vmem>>, vector<32x36xbf16>
    %cst_10 = arith.constant dense<0.000000e+00> : vector<32x128xf32>
    %39 = tpu.matmul %38, %37, %cst_10 {dimension_numbers = #tpu.dot_dimension_numbers<[1], [0], [0], [1], [0, 0, 1, 1], [], []>} : vector<32x36xbf16>, vector<36x128xbf16>, vector<32x128xf32> -> vector<32x128xf32>
    %40 = vector.extract_strided_slice %39 {offsets = [0, 0], sizes = [8, 128], strides = [1, 1]} : vector<32x128xf32> to vector<8x128xf32>
    %41 = vector.extract_strided_slice %39 {offsets = [8, 0], sizes = [8, 128], strides = [1, 1]} : vector<32x128xf32> to vector<8x128xf32>
    %42 = arith.maximumf %40, %41 : vector<8x128xf32>
    %43 = vector.extract_strided_slice %39 {offsets = [16, 0], sizes = [8, 128], strides = [1, 1]} : vector<32x128xf32> to vector<8x128xf32>
    %44 = vector.extract_strided_slice %39 {offsets = [24, 0], sizes = [8, 128], strides = [1, 1]} : vector<32x128xf32> to vector<8x128xf32>
    %45 = arith.maximumf %43, %44 : vector<8x128xf32>
    %46 = arith.maximumf %42, %45 : vector<8x128xf32>
    %c0_11 = arith.constant 0 : index
    %c0_12 = arith.constant 0 : index
    %47 = vector.load %arg4[%c0_11, %c0_12] : memref<8x1xf32, #tpu.memory_space<vmem>>, vector<8x1xf32>
    %48 = vector.broadcast %47 : vector<8x1xf32> to vector<8x128xf32>
    %49 = arith.addf %46, %48 : vector<8x128xf32>
    %c0_13 = arith.constant 0 : index
    %c0_14 = arith.constant 0 : index
    %50 = vector.load %arg5[%c0_13, %c0_14] : memref<8x128xf32, #tpu.memory_space<vmem>>, vector<8x128xf32>
    tpu.vector_store %arg5[%c0_13, %c0_14], %49 {strides = array<i32>} : memref<8x128xf32, #tpu.memory_space<vmem>>, vector<8x128xf32>,
    return
  }
  func.func @transform_0(%arg0: i32) -> (i32, i32) {
    %c0_i32 = arith.constant 0 : i32
    %c0_i32_0 = arith.constant 0 : i32
    return %c0_i32, %arg0 : i32, i32
  }
  func.func @transform_1(%arg0: i32) -> (i32, i32) {
    %c1_i32 = arith.constant 1 : i32
    %0 = arith.addi %arg0, %c1_i32 : i32
    %c1_i32_0 = arith.constant 1 : i32
    %1 = arith.muli %0, %c1_i32_0 : i32
    %c0_i32 = arith.constant 0 : i32
    %c0_i32_1 = arith.constant 0 : i32
    return %c0_i32, %1 : i32, i32
  }
  func.func @transform_2(%arg0: i32) -> (i32, i32) {
    %c0_i32 = arith.constant 0 : i32
    %c0_i32_0 = arith.constant 0 : i32
    %c0_i32_1 = arith.constant 0 : i32
    return %c0_i32, %c0_i32_0 : i32, i32
  }
  func.func @transform_3(%arg0: i32) -> (i32, i32) {
    %c0_i32 = arith.constant 0 : i32
    %c0_i32_0 = arith.constant 0 : i32
    %c0_i32_1 = arith.constant 0 : i32
    return %c0_i32, %c0_i32_0 : i32, i32
  }
  func.func @transform_4(%arg0: i32) -> (i32, i32) {
    %c0_i32 = arith.constant 0 : i32
    %c0_i32_0 = arith.constant 0 : i32
    return %c0_i32, %arg0 : i32, i32
  }
}

</mosaic_0001>

<bundles_post_ra>
// kernel: trans_block_kn.1
= control target key start
LH: loop header
LB: loop body
LE: loop exit
PB: predicated region body
PF: predicated region fallthrough
CT: control target
= control target key end

     0   :  { %s393_s23 = smov 127   ;;  %s512_s0 = inlined_call_operand.vmem [shape: bf16[16,256], index: 0, kind: input, shape index: {}, may-alias: {0,1}]   ;;  %s513_s1 = inlined_call_operand.vmem [shape: bf16[16,256], index: 1, kind: input, shape index: {}, may-alias: {0,1}]   ;;  %s514_s2 = inlined_call_operand.vmem [shape: bf16[32,36], index: 2, kind: input, shape index: {}]   ;;  %s515_s3 = inlined_call_operand.vmem [shape: f32[8,1], index: 3, kind: input, shape index: {}]   ;;  %s516_s4 = inlined_call_operand.vmem [shape: f32[8,128], index: 4, kind: output, shape index: {}]  }
   0x1   :  { %v27_v0 = vld [vmem:[%s512_s0] sm:$0xf]  ;;  %v29_v1 = vld [vmem:[%s512_s0 + $0x8] sm:$0xf]  ;;  %v324_v2 = vld [vmem:[%s513_s1 + $0x4] sm:$0xf] }
   0x2   :  { %28 = vst [vmem:[#allocation2] sm:$0xf] %v27_v0  ;;  %v325_v3 = vld [vmem:[%s513_s1 + $0xc] sm:$0xf]  ;;  %s391_s0 = smov 119   ;;  %s392_s1 = smov 120  }
   0x3   :  { %30 = vst [vmem:[#allocation2 + $0x4] sm:$0xf] %v29_v1 }
   0x4   :  { %78 = vst [vmem:[#allocation3] sm:$0xf] %v324_v2 }
   0x5   :  { %80 = vst [vmem:[#allocation3 + $0x4] sm:$0xf] %v325_v3 }
   0xa   :  { %v432_v4 = vld [vmem:[#allocation2] sm:$0xff]  }
   0xb   :  { %v340_v5 = vunpack.c.l.bf16 %v432_v4  ;;  %v341_v6 = vunpack.c.h.bf16 %v432_v4  ;;  %v394_v4 = vmov 0  }
   0xc   :  { %v436_v7 = vld [vmem:[#allocation3] sm:$0xff]   ;;  %373 = vset.pattern.permute.xlu2 %v394_v4  ;;  %374 = vset.pattern.permute.xlu0 %v394_v4 }
   0xd   :  { %v120_v8 = vmin.f32 %v340_v5, 20.0  ;;  %v344_v9 = vunpack.c.l.bf16 %v436_v7  ;;  %v121_v10 = vmin.f32 %v341_v6, 20.0  ;;  %v345_v11 = vunpack.c.h.bf16 %v436_v7 }
   0xf   :  { %v122_v12 = vmul.f32 1.442695, %v120_v8  ;;  %v170_v13 = vmin.f32 %v344_v9, 20.0  ;;  %v124_v14 = vmul.f32 1.442695, %v121_v10  ;;  %v171_v15 = vmin.f32 %v345_v11, 20.0 }
  0x11   :  { %375 = vpow2.f32 %v122_v12  ;;  %v172_v16 = vmul.f32 1.442695, %v170_v13  ;;  %v174_v17 = vmul.f32 1.442695, %v171_v15 }
  0x12   :  { %377 = vpow2.f32 %v124_v14 }
  0x13   :  { %379 = vpow2.f32 %v172_v16 }
  0x14   :  { %381 = vpow2.f32 %v174_v17 }
  0x17   :  { %v376_v18 = vpop.eup %375 }
  0x18   :  { %v378_v19 = vpop.eup %377  ;;  %v126_v20 = vmul.f32 %v376_v18, %v376_v18  ;;  %v128_v21 = vmul.f32 2.0, %v376_v18 }
  0x19   :  { %v380_v22 = vpop.eup %379  ;;  %v127_v23 = vmul.f32 %v378_v19, %v378_v19  ;;  %v129_v24 = vmul.f32 2.0, %v378_v19 }
  0x1a   :  { %v382_v25 = vpop.eup %381  ;;  %v448_v26 = vadd.f32 %v128_v21, %v126_v20  ;;  %v176_v27 = vmul.f32 %v380_v22, %v380_v22  ;;  %v178_v28 = vmul.f32 2.0, %v380_v22 }
  0x1b   :  { %v450_v29 = vadd.f32 %v129_v24, %v127_v23  ;;  %v177_v30 = vmul.f32 %v382_v25, %v382_v25  ;;  %v179_v31 = vmul.f32 2.0, %v382_v25 }
  0x1c   :  { %v132_v32 = vadd.f32 2.0, %v448_v26  ;;  %v453_v33 = vadd.f32 %v178_v28, %v176_v27 }
  0x1d   :  { %v133_v34 = vadd.f32 2.0, %v450_v29  ;;  %v456_v35 = vadd.f32 %v179_v31, %v177_v30 }
  0x1e   :  { %383 = vrcp.f32 %v132_v32  ;;  %v182_v36 = vadd.f32 2.0, %v453_v33  ;;  %v143_v38 = vand.u32 2147483647, %v132_v32  ;;  %v145_v39 = vand.u32 2147483648, %v132_v32 }
  0x1f   :  { %385 = vrcp.f32 %v133_v34  ;;  %v183_v37 = vadd.f32 2.0, %v456_v35  ;;  %vm139_vm0 = vweird.f32 %v132_v32  ;;  %vm154_vm1 = vweird.f32 %v133_v34 }
  0x20   :  { %387 = vrcp.f32 %v182_v36  ;;  %v160_v43 = vand.u32 2147483648, %v133_v34  ;;  %vm460_vm2 = vcmp.eq.f32.partialorder %v143_v38, 8.507059e+37  ;;  %v146_v45 = vor.u32 1.1754944e-38, %v145_v39 }
  0x21   :  { %389 = vrcp.f32 %v183_v37  ;;  %v158_v47 = vand.u32 2147483647, %v133_v34  ;;  %vm189_vm4 = vweird.f32 %v182_v36  ;;  %v193_v50 = vand.u32 2147483647, %v182_v36 }
  0x22   :  { %v195_v53 = vand.u32 2147483648, %v182_v36  ;;  %v161_v56 = vor.u32 1.1754944e-38, %v160_v43  ;;  %vm204_vm6 = vweird.f32 %v183_v37  ;;  %v210_v61 = vand.u32 2147483648, %v183_v37 }
  0x23   :  { %v208_v1 = vand.u32 2147483647, %v183_v37  ;;  %vm159_vm11 = vcmp.eq.f32.partialorder %v158_v47, 8.507059e+37  ;;  %vm194_vm13 = vcmp.eq.f32.partialorder %v193_v50, 8.507059e+37 }
  0x24   :  { %v384_v40 = vpop.eup %383  ;;  %v196_v12 = vor.u32 1.1754944e-38, %v195_v53  ;;  %v211_v17 = vor.u32 1.1754944e-38, %v210_v61 }
  0x25   :  { %v386_v41 = vpop.eup %385  ;;  %v135_v42 = vmul.f32 %v384_v40, %v132_v32  ;;  %vm140_vm3 = vweird.f32 %v384_v40  ;;  %vm209_vm15 = vcmp.eq.f32.partialorder %v208_v1, 8.507059e+37 }
  0x26   :  { %v150_v46 = vmul.f32 %v386_v41, %v133_v34  ;;  %v388_v48 = vpop.eup %387  ;;  %vm155_vm5 = vweird.f32 %v386_v41  ;;  %vm465_vm7 = vmor %vm139_vm0, %vm140_vm3  ;;  %vm247_vm0 = vcmask 973824   ;;  %vm222_vm3 = vcmask 1039360  }
  0x27   :  { %v136_v49 = vsub.f32 1.0, %v135_v42  ;;  %v390_v51 = vpop.eup %389  ;;  %v185_v52 = vmul.f32 %v388_v48, %v182_v36  ;;  %vm190_vm8 = vweird.f32 %v388_v48  ;;  %vm470_vm9 = vmor %vm154_vm1, %vm155_vm5  ;;  %vm277_vm1 = vcmask 1041408  }
  0x28   :  { %v151_v54 = vsub.f32 1.0, %v150_v46  ;;  %v200_v57 = vmul.f32 %v390_v51, %v183_v37  ;;  %vm205_vm10 = vweird.f32 %v390_v51  ;;  %vm477_vm12 = vmor %vm189_vm4, %vm190_vm8  ;;  %vm250_vm4 = vcmask 1043456  }
  0x29   :  { %v137_v55 = vmul.f32 %v384_v40, %v136_v49  ;;  %v186_v59 = vsub.f32 1.0, %v185_v52  ;;  %vm206_vm14 = vmor %vm204_vm6, %vm205_vm10  ;;  %vm270_vm5 = vcmask 293888  }
  0x2a   :  { %v152_v60 = vmul.f32 %v386_v41, %v151_v54  ;;  %v201_v0 = vsub.f32 1.0, %v200_v57  ;;  %v336_v54 = vld [vmem:[%s514_s2] sm:$0xff] }
  0x2b   :  { %v138_v62 = vadd.f32 %v384_v40, %v137_v55  ;;  %v187_v2 = vmul.f32 %v388_v48, %v186_v59  ;;  %v337_v55 = vld [vmem:[%s514_s2 + $0x8] sm:$0xff] }
  0x2c   :  { %v153_v3 = vadd.f32 %v386_v41, %v152_v60  ;;  %v202_v13 = vmul.f32 %v390_v51, %v201_v0 }
  0x2d   :  { %v142_v8 = vsel %vm465_vm7, %v384_v40, %v138_v62  ;;  %v188_v15 = vadd.f32 %v388_v48, %v187_v2 }
  0x2e   :  { %v147_v14 = vsel %vm460_vm2, %v146_v45, %v142_v8  ;;  %v157_v16 = vsel %vm470_vm9, %v386_v41, %v153_v3  ;;  %v203_v20 = vadd.f32 %v390_v51, %v202_v13  ;;  %vm240_vm2 = vcmask 982016  }
  0x2f   :  { %v148_v18 = vmul.f32 %v147_v14, %v448_v26  ;;  %v162_v19 = vsel %vm159_vm11, %v161_v56, %v157_v16  ;;  %v192_v21 = vsel %vm477_vm12, %v388_v48, %v188_v15 }
  0x30   :  { %v163_v22 = vmul.f32 %v162_v19, %v450_v29  ;;  %v197_v23 = vsel %vm194_vm13, %v196_v12, %v192_v21  ;;  %v207_v24 = vsel %vm206_vm14, %v390_v51, %v203_v20 }
  0x31   :  { %v164_v25 = vmul.f32 %v340_v5, %v148_v18  ;;  %v198_v27 = vmul.f32 %v197_v23, %v453_v33  ;;  %v212_v28 = vsel %vm209_vm15, %v211_v17, %v207_v24 }
  0x32   :  { %v213_v30 = vmul.f32 %v212_v28, %v456_v35  ;;  %v165_v31 = vmul.f32 %v341_v6, %v163_v22 }
  0x33   :  { %v214_v26 = vmul.f32 %v344_v9, %v198_v27  ;;  %v303_v9 = vld [vmem:[%s515_s3] sm:$0xff] }
  0x34   :  { %v215_v32 = vmul.f32 %v345_v11, %v213_v30  ;;  %v226_v5 = vrot.slane %v165_v31, 4  ;;  %306 = vperm.xlu2 %373, %v303_v9  }
  0x35   :  { %v353_v29 = vpack.i.bf16 %v214_v26, %v164_v25 }
  0x36   :  { %v229_v34 = vrot.slane %v215_v32, 4 }
  0x37   :  { %354 = vrot.lane.b32.xlu0 %v353_v29, %s391_s0  ;;  %364 = vrot.lane.b32.xlu1 %v353_v29, %s392_s1 }
  0x38   :  { %v358_v33 = vpack.i.bf16 %v229_v34, %v226_v5 }
  0x3f   :  { %359 = vrot.lane.b32.xlu0 %v358_v33, %s393_s23  ;;  %369 = vrot.lane.b32.xlu1 %v353_v29, %s393_s23 }
  0x8e   :  { %v307_v62 = vpop.permute.xlu2 %306 }
  0xa9   :  { %v355_v6 = vpop.permute.xlu0 %354  ;;  %v365_v7 = vpop.permute.xlu1 %364 }
  0xaa   :  { %v357_v11 = vunpack.i.h.bf16 %v355_v6  ;;  %v356_v35 = vunpack.i.l.bf16 %v355_v6  ;;  %v367_v39 = vunpack.i.h.bf16 %v365_v7  ;;  %v366_v40 = vunpack.i.l.bf16 %v365_v7 }
  0xac   :  { %v248_v36 = vsel %vm247_vm0, %v356_v35, %v357_v11  ;;  %v241_v49 = vsel %vm240_vm2, %v366_v40, %v367_v39 }
  0xad   :  { %v255_v37 = vpack.c.bf16 %v248_v36, %v248_v36 }
  0xaf   :  { %v279_v38 = vsel %vm277_vm1, %v255_v37, 0 }
  0xb0   :  { %286 = vmatpush.bf16.msra.mxu0 %v279_v38  ;;  %346 = vmatpush.bf16.msra.mxu1 %v279_v38 }
  0xb1   :  { %v360_v41 = vpop.permute.xlu0 %359  ;;  %v370_v42 = vpop.permute.xlu1 %369 }
  0xb2   :  { %v362_v43 = vunpack.i.h.bf16 %v360_v41  ;;  %v361_v44 = vunpack.i.l.bf16 %v360_v41  ;;  %v372_v45 = vunpack.i.h.bf16 %v370_v42  ;;  %v371_v46 = vunpack.i.l.bf16 %v370_v42 }
  0xb4   :  { %v234_v47 = vsel %vm222_vm3, %v361_v44, %v362_v43  ;;  %v223_v48 = vsel %vm222_vm3, %v371_v46, %v372_v45 }
  0xb5   :  { %v252_v50 = vsel %vm250_vm4, %v226_v5, %v234_v47  ;;  %v251_v51 = vsel %vm250_vm4, %v223_v48, %v226_v5 }
  0xb6   :  { %v254_v52 = vpack.c.bf16 %v241_v49, %v252_v50  ;;  %v253_v53 = vpack.c.bf16 %v251_v51, %v164_v25 }
  0xb8   :  { %287 = vmatpush.bf16.msra.mxu0 %v254_v52  ;;  %347 = vmatpush.bf16.msra.mxu1 %v254_v52 }
  0xbc   :  { %288 = vmatpush.bf16.msra.mxu0 %v253_v53  ;;  %348 = vmatpush.bf16.msra.mxu1 %v253_v53 }
  0xbf   :  { %334 = vmatmul.msk.bf16.vlgmr.msra.gmra.mxu0 %vm270_vm5, %v336_v54  ;;  %335 = vmatmul.msk.bf16.vlgmr.msra.gmra.mxu1 %vm270_vm5, %v337_v55 }
 0x13c   :  { %v290_v56 = vpop.f32.mrf.mxu0  ;;  %v295_v57 = vpop.f32.mrf.mxu1 }
 0x144   :  { %v292_v58 = vpop.f32.mrf.mxu0  ;;  %v297_v59 = vpop.f32.mrf.mxu1 }
 0x145   :  { %v300_v60 = vmax.f32 %v290_v56, %v292_v58  ;;  %v301_v61 = vmax.f32 %v295_v57, %v297_v59 }
 0x147   :  { %v302_v63 = vmax.f32 %v300_v60, %v301_v61 }
 0x149   :  { %v309_v0 = vadd.f32 %v307_v62, %v302_v63 }
 0x14b   :  { %310 = vst [vmem:[%s516_s4] sm:$0xff] %v309_v0 }

</bundles_post_ra>
